<compile_context>
chip_gen: v7x
topology: tpu7x:2x2x1
jax: 0.10.0
libtpu: 0.0.40
codegen_flags: <defaults>
</compile_context>

<pallas_src>
import functools
import math

import jax
import jax.numpy as jnp
from jax import lax
from jax.experimental import pallas as pl
from jax.experimental.pallas import tpu as pltpu


# ----------------------------- Pallas kernels ------------------------------

def _linear_kernel(x_ref, w_ref, b_ref, o_ref):
    """Full-width linear for one row tile.

    x: (tm, D) f32, w: (D, D) bf16 resident, b: (1, D) f32 resident,
    o: (tm, D) f32.  bf16 MXU operands, f32 accumulation, f32 bias add.
    """
    acc = jnp.dot(x_ref[...].astype(jnp.bfloat16), w_ref[...],
                  preferred_element_type=jnp.float32)
    o_ref[...] = (acc + b_ref[...]).astype(o_ref.dtype)


def _attention_kernel(q_ref, k_ref, v_ref, ctx_ref, p_ref, *, h, d_k, sm_scale):
    """Scaled dot-product attention, all heads of one (batch, q-tile) block.

    q: (1, tq, D), k/v: (1, S, D), ctx: (1, tq, D), p: (1, h, tq, S).
    Heads are split with static lane slices; ctx is written lane-dense.
    """
    # Fold 1/sqrt(d_k) into q once (touches tq*D elems instead of h*tq*S scores).
    qs = (q_ref[0] * sm_scale).astype(jnp.bfloat16)    # (tq, D)
    kb = k_ref[0].astype(jnp.bfloat16)                 # (S, D)
    vb = v_ref[0].astype(jnp.bfloat16)                 # (S, D)

    for hd in range(h):                                # static unroll over heads
        lo = hd * d_k
        q_h = qs[:, lo:lo + d_k]                       # (tq, d_k) bf16
        k_h = kb[:, lo:lo + d_k]                       # (S,  d_k) bf16
        v_h = vb[:, lo:lo + d_k]                       # (S,  d_k) bf16

        # NT matmul: contract q dim 1 vs k dim 1, no explicit transpose.
        s = lax.dot_general(q_h, k_h,
                            dimension_numbers=(((1,), (1,)), ((), ())),
                            preferred_element_type=jnp.float32)   # (tq, S) f32

        # Numerically-stable softmax in f32 (v5e safe); reciprocal on the EUP.
        m = jnp.max(s, axis=-1, keepdims=True)
        e = jnp.exp(s - m)
        p = e * pl.reciprocal(jnp.sum(e, axis=-1, keepdims=True), approx=True)

        p_ref[0, hd] = p.astype(p_ref.dtype)
        ctx_h = jnp.dot(p.astype(jnp.bfloat16), v_h,
                        preferred_element_type=jnp.float32)       # (tq, d_k) f32
        ctx_ref[0, :, lo:lo + d_k] = ctx_h.astype(ctx_ref.dtype)


# ------------------------------ JAX wrappers --------------------------------

def _row_tile(n, cap=512):
    """Largest row tile (<= cap): full extent if small, else cap (multiple of 8)."""
    return n if n <= cap else cap


def _linear(x2d, w_bf16, b2d):
    """x2d: (M, D) f32, w_bf16: (D, Dout) bf16, b2d: (1, Dout) f32 -> (M, Dout) f32."""
    M, D = x2d.shape
    Dout = w_bf16.shape[1]
    tm = _row_tile(M)
    return pl.pallas_call(
        _linear_kernel,
        out_shape=jax.ShapeDtypeStruct((M, Dout), x2d.dtype),
        grid=(pl.cdiv(M, tm),),
        in_specs=[
            pl.BlockSpec((tm, D), lambda i: (i, 0)),       # row tile
            pl.BlockSpec((D, Dout), lambda i: (0, 0)),     # weights resident (bf16)
            pl.BlockSpec((1, Dout), lambda i: (0, 0)),     # bias resident
        ],
        out_specs=pl.BlockSpec((tm, Dout), lambda i: (i, 0)),
        compiler_params=pltpu.CompilerParams(
            dimension_semantics=("parallel",)),
    )(x2d, w_bf16, b2d)


def _pallas_attention(q, k, v, h, sm_scale, probs_dtype):
    """q/k/v: (B, S, D) lane-dense -> ctx (B, S, D), attn (B, h, S, S)."""
    B, S, D = q.shape
    d_k = D // h
    tq = _row_tile(S)

    # Explicit scoped-VMEM budget: double-buffered q/k/v/ctx blocks + probs block,
    # with generous headroom (v5e default scoped limit is only 16 MiB).
    p_itemsize = jnp.dtype(probs_dtype).itemsize
    block_bytes = (tq * D + 2 * S * D + tq * D) * 4 + h * tq * S * p_itemsize
    vmem_limit = int(min(max(4 * block_bytes, 8 << 20), 64 << 20))

    kern = functools.partial(_attention_kernel, h=h, d_k=d_k, sm_scale=sm_scale)
    ctx, attn = pl.pallas_call(
        kern,
        out_shape=(
            jax.ShapeDtypeStruct((B, S, D), q.dtype),
            jax.ShapeDtypeStruct((B, h, S, S), probs_dtype),
        ),
        grid=(B, pl.cdiv(S, tq)),
        in_specs=[
            pl.BlockSpec((1, tq, D), lambda b, qi: (b, qi, 0)),
            pl.BlockSpec((1, S, D), lambda b, qi: (b, 0, 0)),   # K resident over q tiles
            pl.BlockSpec((1, S, D), lambda b, qi: (b, 0, 0)),   # V resident over q tiles
        ],
        out_specs=(
            pl.BlockSpec((1, tq, D), lambda b, qi: (b, qi, 0)),
            pl.BlockSpec((1, h, tq, S), lambda b, qi: (b, 0, qi, 0)),
        ),
        compiler_params=pltpu.CompilerParams(
            dimension_semantics=("parallel", "parallel"),
            vmem_limit_bytes=vmem_limit),
    )(q, k, v)
    return ctx, attn


def init_params(key, d_model):
    """Deterministic init of the 4 Linear(d_model, d_model) layers."""
    bound = 1.0 / math.sqrt(d_model)
    keys = jax.random.split(key, 8)
    params = {}
    names = ["q", "k", "v", "out"]
    for i, n in enumerate(names):
        w = jax.random.uniform(keys[2 * i], (d_model, d_model),
                               jnp.float32, -bound, bound)
        b = jax.random.uniform(keys[2 * i + 1], (d_model,),
                               jnp.float32, -bound, bound)
        params[n] = (w, b)
    return params


def multi_headed_attention(params, query, key, value, h,
                           probs_dtype=jnp.float32):
    """Forward pass of MultiHeadedAttention (mask=None, eval-mode dropout)."""
    B, S, D = query.shape
    d_k = D // h
    sm_scale = 1.0 / math.sqrt(d_k)
    M = B * S

    # One-time bf16 weight conversion (halves weight DMA / VMEM residency).
    wq, bq = params["q"]
    wk, bk = params["k"]
    wv, bv = params["v"]
    wo, bo = params["out"]
    wq_b, wk_b, wv_b, wo_b = (w.astype(jnp.bfloat16) for w in (wq, wk, wv, wo))

    # Full-width projections, lane-dense (M, D) outputs; reshapes are free.
    q = _linear(query.reshape(M, D), wq_b, bq.reshape(1, D)).reshape(B, S, D)
    k = _linear(key.reshape(M, D), wk_b, bk.reshape(1, D)).reshape(B, S, D)
    v = _linear(value.reshape(M, D), wv_b, bv.reshape(1, D)).reshape(B, S, D)

    # Attention: all heads per (batch, q-tile) step; ctx comes back in (B, S, D).
    ctx, attn = _pallas_attention(q, k, v, h, sm_scale, probs_dtype)

    # Output projection: single full-width matmul, no head reduction needed.
    out = _linear(ctx.reshape(M, D), wo_b, bo.reshape(1, D)).reshape(B, S, D)
    return out, attn


# -------------------------- pure-JAX reference ------------------------------

def _reference(params, query, key, value, h):
    B, S, D = query.shape
    d_k = D // h

    def lin(name, x):
        w, b = params[name]
        return x @ w + b

    def split(x):
        return jnp.transpose(x.reshape(B, S, h, d_k), (0, 2, 1, 3))

    q, k, v = split(lin("q", query)), split(lin("k", key)), split(lin("v", value))
    scores = jnp.einsum("bhqd,bhkd->bhqk", q, k) / math.sqrt(d_k)
    p = jax.nn.softmax(scores, axis=-1)
    ctx = jnp.einsum("bhqk,bhkd->bhqd", p, v)
    ctx = jnp.transpose(ctx, (0, 2, 1, 3)).reshape(B, S, D)
    w_o, b_o = params["out"]
    return ctx @ w_o + b_o, p


# --------------------------------- main --------------------------------------

if __name__ == "__main__":
    B, S, D, H = 2, 8, 32, 4

    root = jax.random.PRNGKey(0)
    kp, kq, kk, kv = jax.random.split(root, 4)
    params = init_params(kp, D)

    query = jax.random.normal(kq, (B, S, D), jnp.float32)
    key_x = jax.random.normal(kk, (B, S, D), jnp.float32)
    value = jax.random.normal(kv, (B, S, D), jnp.float32)

    out, attn = multi_headed_attention(params, query, key_x, value, H)
    out, attn = jax.block_until_ready((out, attn))

    ref_out, ref_attn = _reference(params, query, key_x, value, H)
    assert out.shape == (B, S, D) and attn.shape == (B, H, S, S)
    # Tolerances loosened for bf16 MXU operands (f32 accumulation) in all
    # matmuls and the approximate (EUP) reciprocal in the softmax.
    assert jnp.allclose(out, ref_out, atol=5e-2, rtol=5e-2)
    assert jnp.allclose(attn, ref_attn, atol=3e-2, rtol=3e-2)

    print("KERNEL_OK")
</pallas_src>

<mosaic_0001>
module attributes {stable_mosaic.version = 11 : i64} {
  func.func @_linear_kernel(%arg0: i32, %arg1: memref<16x32xf32, #tpu.memory_space<vmem>>, %arg2: memref<32x32xbf16, #tpu.memory_space<vmem>>, %arg3: memref<1x32xf32, #tpu.memory_space<vmem>>, %arg4: memref<16x32xf32, #tpu.memory_space<vmem>>) attributes {dimension_semantics = [#tpu.dimension_semantics<parallel>], iteration_bounds = array<i64: 1>, scalar_prefetch = 0 : i64, scratch_operands = 0 : i64, tpu.core_type = #tpu.core_type<tc>, window_params = [{transform_indices = @transform_0, window_bounds = array<i64: 16, 32>}, {pipeline_mode = #tpu.pipeline_mode<synchronous>, transform_indices = @transform_1, window_bounds = array<i64: 32, 32>}, {pipeline_mode = #tpu.pipeline_mode<synchronous>, transform_indices = @transform_2, window_bounds = array<i64: 1, 32>}, {transform_indices = @transform_3, window_bounds = array<i64: 16, 32>}]} {
    %c0 = arith.constant 0 : index
    %c0_0 = arith.constant 0 : index
    %0 = vector.load %arg1[%c0, %c0_0] : memref<16x32xf32, #tpu.memory_space<vmem>>, vector<16x32xf32>
    %1 = arith.truncf %0 : vector<16x32xf32> to vector<16x32xbf16>
    %c0_1 = arith.constant 0 : index
    %c0_2 = arith.constant 0 : index
    %2 = vector.load %arg2[%c0_1, %c0_2] : memref<32x32xbf16, #tpu.memory_space<vmem>>, vector<32x32xbf16>
    %cst = arith.constant dense<0.000000e+00> : vector<16x32xf32>
    %3 = tpu.matmul %1, %2, %cst {dimension_numbers = #tpu.dot_dimension_numbers<[1], [0], [0], [1], [0, 0, 1, 1], [], []>} : vector<16x32xbf16>, vector<32x32xbf16>, vector<16x32xf32> -> vector<16x32xf32>
    %c0_3 = arith.constant 0 : index
    %c0_4 = arith.constant 0 : index
    %4 = vector.load %arg3[%c0_3, %c0_4] : memref<1x32xf32, #tpu.memory_space<vmem>>, vector<1x32xf32>
    %5 = vector.broadcast %4 : vector<1x32xf32> to vector<16x32xf32>
    %6 = arith.addf %3, %5 : vector<16x32xf32>
    %c0_5 = arith.constant 0 : index
    %c0_6 = arith.constant 0 : index
    %7 = vector.load %arg4[%c0_5, %c0_6] : memref<16x32xf32, #tpu.memory_space<vmem>>, vector<16x32xf32>
    tpu.vector_store %arg4[%c0_5, %c0_6], %6 {strides = array<i32>} : memref<16x32xf32, #tpu.memory_space<vmem>>, vector<16x32xf32>,
    return
  }
  func.func @transform_0(%arg0: i32) -> (i32, i32) {
    %c0_i32 = arith.constant 0 : i32
    %c0_i32_0 = arith.constant 0 : i32
    return %arg0, %c0_i32 : i32, i32
  }
  func.func @transform_1(%arg0: i32) -> (i32, i32) {
    %c0_i32 = arith.constant 0 : i32
    %c0_i32_0 = arith.constant 0 : i32
    %c0_i32_1 = arith.constant 0 : i32
    return %c0_i32, %c0_i32_0 : i32, i32
  }
  func.func @transform_2(%arg0: i32) -> (i32, i32) {
    %c0_i32 = arith.constant 0 : i32
    %c0_i32_0 = arith.constant 0 : i32
    %c0_i32_1 = arith.constant 0 : i32
    return %c0_i32, %c0_i32_0 : i32, i32
  }
  func.func @transform_3(%arg0: i32) -> (i32, i32) {
    %c0_i32 = arith.constant 0 : i32
    %c0_i32_0 = arith.constant 0 : i32
    return %arg0, %c0_i32 : i32, i32
  }
}

</mosaic_0001>

<bundles_post_ra>
// kernel: tpu_custom_call.1
= control target key start
LH: loop header
LB: loop body
LE: loop exit
PB: predicated region body
PF: predicated region fallthrough
CT: control target
= control target key end

     0   :  { %8 = vsyncpa [#allocation3], 0  ;;  %s307_s0 = inlined_call_operand.hbm [shape: f32[16,32], index: 0, kind: input, shape index: {}]   ;;  %s308_s1 = inlined_call_operand.hbm [shape: bf16[32,32], index: 1, kind: input, shape index: {}]   ;;  %s309_s2 = inlined_call_operand.vmem [shape: f32[1,32], index: 2, kind: input, shape index: {}]   ;;  %s310_s3 = inlined_call_operand.hbm [shape: f32[16,32], index: 3, kind: output, shape index: {}]  }
   0x1   :  { %9 = vsyncpa [#allocation6], 0 }
   0x2   :  { %10 = vsyncpa [#allocation4], 0  ;;  %s233_s12 = smov [#allocation2]   ;;  %s161_s16 = scalar_lea.hbm %s307_s0, 256 }
   0x3   :  { %s16_s13 = sshll.u32 %s233_s12, 4  ;;  %p162_p0 = scmp.ne.s32.totalorder %s307_s0, %s161_s16  ;;  %s17_s13 = int_to_ptr.vmem [resolvable:$true] %s16_s13 }
   0x4   :  { %p165_p1 = scmp.lt.u32.totalorder %s161_s16, %s307_s0 }
   0x6   :  { %p167_p2 = pnand %p165_p1, %p162_p0 }
   0x8   :  { %170 = shalt.err (!%p167_p2)
}
   0x9   :  { %s171_s21 = scalar_lea.vmem %s17_s13, 256  ;;  %p176_p4 = scmp.lt.s32.totalorder %s17_s13, %s17_s13 }
   0xa   :  { %p172_p3 = scmp.ne.s32.totalorder %s17_s13, %s171_s21  ;;  %p177_p5 = scmp.lt.s32.totalorder %s171_s21, %s171_s21 }
   0xc   :  { %p178_p6 = por %p177_p5, %p176_p4 }
   0xe   :  { %p179_p7 = pnand %p178_p6, %p172_p3 }
  0x10   :  { %182 = shalt.err (!%p179_p7)
}
  0x11   :  { %s234_s22 = smov 128   ;;  %s235_s23 = smov 8  }
  0x12   :  { %22 = dma.hbm_to_vmem [thread:$0]  %s307_s0, 256, %s17_s13, [#allocation3], %s234_s22, %s234_s22, %s235_s23  }
  0x13   :  { %s236_s26 = smov [#allocation5]   ;;  %s183_s30 = scalar_lea.hbm %s308_s1, 256 }
  0x14   :  { %s28_s27 = sshll.u32 %s236_s26, 4  ;;  %p184_p8 = scmp.ne.s32.totalorder %s308_s1, %s183_s30  ;;  %s29_s27 = int_to_ptr.vmem [resolvable:$true] %s28_s27 }
  0x15   :  { %p187_p9 = scmp.lt.u32.totalorder %s183_s30, %s308_s1 }
  0x17   :  { %p189_p10 = pnand %p187_p9, %p184_p8 }
  0x19   :  { %192 = shalt.err (!%p189_p10)
}
  0x1a   :  { %s193_s8 = scalar_lea.vmem %s29_s27, 256  ;;  %p198_p12 = scmp.lt.s32.totalorder %s29_s27, %s29_s27 }
  0x1b   :  { %p194_p11 = scmp.ne.s32.totalorder %s29_s27, %s193_s8  ;;  %p199_p13 = scmp.lt.s32.totalorder %s193_s8, %s193_s8 }
  0x1d   :  { %p200_p0 = por %p199_p13, %p198_p12 }
  0x1f   :  { %p201_p1 = pnand %p200_p0, %p194_p11 }
  0x21   :  { %204 = shalt.err (!%p201_p1)
}
  0x22   :  { %s237_s0 = smov 64   ;;  %s238_s9 = smov 4  }
  0x23   :  { %34 = dma.hbm_to_vmem [thread:$0]  %s308_s1, 256, %s29_s27, [#allocation6], %s237_s0, %s237_s0, %s238_s9  }
  0x24   :  { %227 = dma.done.wait [#allocation3], 256  }
  0x25   :  { %228 = vsyncadd [#allocation3], 4294967040 }
  0x26   :  { %229 = dma.done.wait [#allocation6], 256  }
  0x27   :  { %230 = vsyncadd [#allocation6], 4294967040  ;;  %v239_v0 = vmov 0.0   ;;  %vm240_vm0 = vmmov 0   ;;  %v159_v1 = vld [vmem:[#allocation5] sm:$0xff]   ;;  %v160_v2 = vld [vmem:[#allocation5 + $0x8] sm:$0xff]  }
  0x28   :  { %142 = vmatprep.subr.bf16.mxu0 %v239_v0  ;;  %146 = vmatprep.mubr.msk.bf16.mxu0 %vm240_vm0, %v239_v0  ;;  %v44_v3 = vld [vmem:[#allocation2] sm:$0xff]  ;;  %v45_v4 = vld [vmem:[#allocation2 + $0x8] sm:$0xff]  ;;  %vm70_vm1 = vcmask 261120   ;;  %s241_s13 = smov [#allocation7]  }
  0x29   :  { %143 = vmatpush3.bf16.msra.mxu0 %v159_v1  ;;  %v46_v5 = vpack.c.bf16 %v45_v4, %v44_v3  ;;  %v135_v6 = vld [vmem:[%s309_s2] ss:$0 sm:$0xff]  ;;  %s122_s14 = sshll.u32 %s241_s13, 4  ;;  %s123_s14 = int_to_ptr.vmem [resolvable:$true] %s122_s14 }
  0x2a   :  { %144 = vmatprep.subr.bf16.mxu0 %v239_v0  ;;  %s205_s15 = scalar_lea.vmem %s123_s14, 256  ;;  %p210_p3 = scmp.lt.s32.totalorder %s123_s14, %s123_s14 }
  0x2b   :  { %p206_p2 = scmp.ne.s32.totalorder %s123_s14, %s205_s15  ;;  %p211_p4 = scmp.lt.s32.totalorder %s205_s15, %s205_s15 }
  0x2d   :  { %145 = vmatpush3.bf16.msra.mxu0 %v160_v2  ;;  %p212_p5 = por %p211_p4, %p210_p3 }
  0x2f   :  { %p213_p6 = pnand %p212_p5, %p206_p2 }
  0x30   :  { %147 = vmatmul.mubr.msk.bf16.vlgmr.msra.gmra.mrb[0].mxu0 %vm70_vm1, %v46_v5 }
 0x103   :  { %v108_v7 = vpop.f32.mrb[0].mxu0 }
 0x104   :  { %v109_v8 = vadd.f32 %v135_v6, %v108_v7  ;;  %v148_v9 = vpop.f32.mrb[1].mxu0 }
 0x105   :  { %v111_v10 = vpop.f32.mrb[2].mxu0 }
 0x106   :  { %115 = vst.msk [vmem:[#allocation7] sm:$0xff] %vm70_vm1, %v109_v8  ;;  %v112_v11 = vadd.f32 %v135_v6, %v111_v10  ;;  %v149_v12 = vpop.f32.mrb[3].mxu0 }
 0x108   :  { %116 = vst.msk [vmem:[#allocation7 + $0x8] sm:$0xff] %vm70_vm1, %v112_v11 }
 0x109   :  { %216 = shalt.err (!%p213_p6)
}
 0x10a   :  { %s217_s17 = scalar_lea.hbm %s310_s3, 256 }
 0x10b   :  { %p218_p7 = scmp.ne.s32.totalorder %s310_s3, %s217_s17  ;;  %p221_p8 = scmp.lt.u32.totalorder %s217_s17, %s310_s3 }
 0x10d   :  { %p223_p9 = pnand %p221_p8, %p218_p7 }
 0x10f   :  { %226 = shalt.err (!%p223_p9)
}
 0x110   :  { %128 = dma.vmem_to_hbm [thread:$0]  %s123_s14, 256, %s310_s3, [#allocation4], %s234_s22, %s234_s22, %s235_s23  }
 0x111   :  { %231 = dma.done.wait [#allocation4], 256  }
 0x112   :  { %232 = vsyncadd [#allocation4], 4294967040 }
 0x113   :  { %132 = vsyncpa [#allocation3], 1 }
 0x114   :  { %133 = vsyncpa [#allocation6], 1 }
 0x115   :  { %134 = vsyncpa [#allocation4], 1 }

</bundles_post_ra>
